<compile_context>
chip_gen: v7x
topology: tpu7x:2x2x1
jax: 0.10.0
libtpu: 0.0.40
codegen_flags: <defaults>
</compile_context>

<pallas_src>
import jax
import jax.numpy as jnp
from jax.experimental import pallas as pl
from jax.experimental.pallas import tpu as pltpu

_MAX_BLOCK_BYTES = 4 << 20   # per-array, per-block target (review: 2-4 MiB)
_VMEM_HEADROOM = 8 << 20     # on top of the 3 arrays x 2 buffers live footprint


def _unit_kernel(pred_ref, target_ref, out_ref):
    # weight == 1.0 path: pure streaming subtract
    out_ref[...] = pred_ref[...] - target_ref[...]


def _weighted_kernel(w_ref, pred_ref, target_ref, out_ref):
    # w_ref is a (1,) float32 scalar in SMEM (scalar prefetch) -> no recompile
    # when the weight value changes between calls.  Multiply is done in f32
    # (matches torch float-scalar * tensor semantics) then cast back.
    w = w_ref[0]
    diff = (pred_ref[...] - target_ref[...]).astype(jnp.float32)
    out_ref[...] = (w * diff).astype(out_ref.dtype)


def _vmem_capacity_bytes():
    try:
        return int(pltpu.get_tpu_info().vmem_capacity_bytes)
    except Exception:
        return 64 << 20   # conservative default (v7x per-TC VMEM)


def _choose_layout(total: int, itemsize: int, max_block_bytes: int):
    """Pick a lane-dense (rows, width) flattening and a row tile.

    Returns (width, rows, tile_rows, num_tiles, padded_total).
    """
    # widest lane dim (multiple of 128) that divides `total`; otherwise pad.
    width = None
    for w in (1024, 512, 256, 128):
        if total % w == 0:
            width = w
            break
    padded_total = total
    if width is None:
        width = 512
        padded_total = ((total + width - 1) // width) * width
    rows = padded_total // width

    sublane = max(8, 32 // itemsize)  # 8 for f32, 16 for bf16, 32 for int8/fp8
    target_rows = max(sublane,
                      (max_block_bytes // (width * itemsize)) // sublane * sublane)

    if rows <= sublane:
        # single full-extent block (always a legal block shape)
        tile_rows = rows
    else:
        # candidates: multiples of sublane, <= target, and <= rows/2 so that the
        # grid has >= 2 steps (both v7x TensorCores get work).  Prefer an exact
        # divisor of rows (no ragged masked final tile) and an even tile count.
        cap = min(target_rows, (rows // 2 // sublane) * sublane)
        cap = max(cap, sublane)
        best = None
        t = cap
        while t >= sublane:
            if rows % t == 0:
                n = rows // t
                score = (n % 2 == 0, t)   # prefer even count, then larger tile
                if best is None or score > best[0]:
                    best = (score, t)
                if n % 2 == 0:
                    break  # first even divisor found going downward = largest
            t -= sublane
        tile_rows = best[1] if best is not None else cap  # cap -> ragged tail OK

    num_tiles = pl.cdiv(rows, tile_rows)
    return width, rows, tile_rows, num_tiles, padded_total


def residuals_step(preds, targets, weight=1.0, names=None,
                   use_pallas=None, donate_inputs=False):
    """Pallas equivalent of Residuals.step().

    preds / targets: (num_res, B, C, H, W) -- stacked residual-term inputs.
    Returns (F, info): F is torch.cat(residuals).reshape(-1); info maps each
    residual name to its (B, C, H, W) residual tensor (slices of the same
    contiguous kernel output).  For the slices to stay copy-free, call this
    inside the caller's jit so XLA fuses them into their consumers.

    use_pallas: None = auto (fast jnp path for inputs that fit in one block),
                True/False = force.
    donate_inputs: alias the output onto `preds` (only when the caller no
                longer needs it -- saves one full-size HBM allocation).
    """
    assert preds.shape == targets.shape, "preds/targets must be stacked identically"
    num_res = preds.shape[0]
    orig_shape = preds.shape
    total = int(preds.size)
    itemsize = jnp.dtype(preds.dtype).itemsize

    unit_weight = isinstance(weight, (int, float)) and float(weight) == 1.0

    vmem_cap = _vmem_capacity_bytes()
    max_block_bytes = min(_MAX_BLOCK_BYTES, max(vmem_cap // 16, 256 << 10))

    if use_pallas is None:
        # single-block regime: Pallas launch + DMA setup is pure overhead vs.
        # an XLA-fused elementwise op that already hits the HBM roofline.
        use_pallas = total * itemsize > max_block_bytes

    if not use_pallas:
        if unit_weight:
            out_full = preds - targets
        else:
            w = jnp.float32(weight)
            out_full = ((preds - targets).astype(jnp.float32) * w).astype(preds.dtype)
        F = out_full.reshape(-1)
        res_full = out_full
    else:
        width, rows, tile_rows, num_tiles, padded_total = _choose_layout(
            total, itemsize, max_block_bytes)

        p_flat = preds.reshape(-1)
        t_flat = targets.reshape(-1)
        if padded_total != total:
            # rare path (total not a multiple of 128): zero-pad + trim after.
            pad = padded_total - total
            p_flat = jnp.pad(p_flat, (0, pad))
            t_flat = jnp.pad(t_flat, (0, pad))
        p2 = p_flat.reshape(rows, width)   # free reshape: data is contiguous,
        t2 = t_flat.reshape(rows, width)   # the "cat" is implicit

        block_bytes = tile_rows * width * itemsize
        live_bytes = 3 * 2 * block_bytes   # 2 in + 1 out, double-buffered
        vmem_limit = int(min(vmem_cap, live_bytes + _VMEM_HEADROOM))

        out_shape = jax.ShapeDtypeStruct((rows, width), preds.dtype)
        cparams = pltpu.CompilerParams(
            dimension_semantics=("parallel",),   # >=2 tiles -> both TCs on v7x
            vmem_limit_bytes=vmem_limit)

        if unit_weight:
            cost = pl.CostEstimate(flops=padded_total, transcendentals=0,
                                   bytes_accessed=3 * padded_total * itemsize)
            io_alias = {0: 0} if donate_inputs else {}
            out = pl.pallas_call(
                _unit_kernel,
                out_shape=out_shape,
                grid_spec=pltpu.PrefetchScalarGridSpec(
                    num_scalar_prefetch=0,
                    grid=(num_tiles,),
                    in_specs=[
                        pl.BlockSpec((tile_rows, width), lambda i: (i, 0)),
                        pl.BlockSpec((tile_rows, width), lambda i: (i, 0)),
                    ],
                    out_specs=pl.BlockSpec((tile_rows, width), lambda i: (i, 0)),
                ),
                compiler_params=cparams,
                cost_estimate=cost,
                input_output_aliases=io_alias,
            )(p2, t2)
        else:
            cost = pl.CostEstimate(flops=2 * padded_total, transcendentals=0,
                                   bytes_accessed=3 * padded_total * itemsize)
            io_alias = {1: 0} if donate_inputs else {}
            w_arr = jnp.asarray([weight], dtype=jnp.float32)
            out = pl.pallas_call(
                _weighted_kernel,
                out_shape=out_shape,
                grid_spec=pltpu.PrefetchScalarGridSpec(
                    num_scalar_prefetch=1,   # weight lands in SMEM
                    grid=(num_tiles,),
                    in_specs=[
                        pl.BlockSpec((tile_rows, width), lambda i, w: (i, 0)),
                        pl.BlockSpec((tile_rows, width), lambda i, w: (i, 0)),
                    ],
                    out_specs=pl.BlockSpec((tile_rows, width), lambda i, w: (i, 0)),
                ),
                compiler_params=cparams,
                cost_estimate=cost,
                input_output_aliases=io_alias,
            )(w_arr, p2, t2)

        F = out.reshape(-1)
        if padded_total != total:
            F = F[:total]
        res_full = F.reshape(orig_shape)

    if names is None:
        names = [f"residual_{i}" for i in range(num_res)]
    info = {name: res_full[i] for i, name in enumerate(names)}
    # TODO(synk): base-class forward() is NotImplementedError; a concrete
    # weighted-difference residual is used here as the representative term.
    return F, info


def _reference(preds, targets, weight):
    terms = [weight * (preds[i] - targets[i]) for i in range(preds.shape[0])]
    return jnp.concatenate(terms, axis=0).reshape(-1), terms


if __name__ == "__main__":
    key = jax.random.PRNGKey(0)

    def make(shape, k):
        k1, k2 = jax.random.split(jax.random.fold_in(key, k))
        return (jax.random.normal(k1, shape, dtype=jnp.float32),
                jax.random.normal(k2, shape, dtype=jnp.float32))

    ok = True

    # 1) small shape, force the Pallas kernel (single full-extent block),
    #    exercise both the unit-weight and SMEM-scalar-weight paths.
    preds, targets = make((2, 2, 4, 16, 16), 0)
    for weight in (1.0, 0.5):
        F, info = residuals_step(preds, targets, weight=weight, use_pallas=True)
        F = jax.block_until_ready(F)
        F_ref, terms = _reference(preds, targets, weight)
        ok &= F.shape == F_ref.shape
        ok &= bool(jnp.allclose(F, F_ref, atol=1e-6, rtol=1e-6))
        for i, (name, r) in enumerate(info.items()):
            ok &= r.shape == preds.shape[1:]
            ok &= bool(jnp.allclose(r, terms[i], atol=1e-6, rtol=1e-6))

    # 2) larger shape, force the Pallas kernel -> multi-tile even grid,
    #    exact-dividing tiles, pipelined streaming.
    preds, targets = make((2, 2, 4, 64, 64), 1)
    F, info = residuals_step(preds, targets, weight=0.25, use_pallas=True)
    F = jax.block_until_ready(F)
    F_ref, _ = _reference(preds, targets, 0.25)
    ok &= bool(jnp.allclose(F, F_ref, atol=1e-6, rtol=1e-6))

    # 3) auto dispatch on a tiny input -> jnp fast path (no pallas launch).
    preds, targets = make((2, 2, 4, 16, 16), 2)
    F, info = residuals_step(preds, targets, weight=2.0)
    F = jax.block_until_ready(F)
    F_ref, _ = _reference(preds, targets, 2.0)
    ok &= bool(jnp.allclose(F, F_ref, atol=1e-6, rtol=1e-6))

    # 4) total not a multiple of 128 -> pad + trim path, forced through Pallas.
    preds, targets = make((1, 1, 3, 10, 7), 3)
    F, info = residuals_step(preds, targets, weight=0.5, use_pallas=True)
    F = jax.block_until_ready(F)
    F_ref, _ = _reference(preds, targets, 0.5)
    ok &= F.shape == F_ref.shape
    ok &= bool(jnp.allclose(F, F_ref, atol=1e-6, rtol=1e-6))

    assert ok
    print("KERNEL_OK")
</pallas_src>

<mosaic_0001>
module attributes {stable_mosaic.version = 11 : i64} {
  func.func @_unit_kernel(%arg0: i32, %arg1: memref<4x1024xf32, #tpu.memory_space<vmem>>, %arg2: memref<4x1024xf32, #tpu.memory_space<vmem>>, %arg3: memref<4x1024xf32, #tpu.memory_space<vmem>>) attributes {dimension_semantics = [#tpu.dimension_semantics<parallel>], iteration_bounds = array<i64: 1>, scalar_prefetch = 0 : i64, scratch_operands = 0 : i64, tpu.core_type = #tpu.core_type<tc>, window_params = [{transform_indices = @transform_0, window_bounds = array<i64: 4, 1024>}, {transform_indices = @transform_1, window_bounds = array<i64: 4, 1024>}, {transform_indices = @transform_2, window_bounds = array<i64: 4, 1024>}]} {
    %c0 = arith.constant 0 : index
    %c0_0 = arith.constant 0 : index
    %0 = vector.load %arg1[%c0, %c0_0] : memref<4x1024xf32, #tpu.memory_space<vmem>>, vector<4x1024xf32>
    %c0_1 = arith.constant 0 : index
    %c0_2 = arith.constant 0 : index
    %1 = vector.load %arg2[%c0_1, %c0_2] : memref<4x1024xf32, #tpu.memory_space<vmem>>, vector<4x1024xf32>
    %2 = arith.subf %0, %1 : vector<4x1024xf32>
    %c0_3 = arith.constant 0 : index
    %c0_4 = arith.constant 0 : index
    %3 = vector.load %arg3[%c0_3, %c0_4] : memref<4x1024xf32, #tpu.memory_space<vmem>>, vector<4x1024xf32>
    tpu.vector_store %arg3[%c0_3, %c0_4], %2 {strides = array<i32>} : memref<4x1024xf32, #tpu.memory_space<vmem>>, vector<4x1024xf32>,
    return
  }
  func.func @transform_0(%arg0: i32) -> (i32, i32) {
    %c0_i32 = arith.constant 0 : i32
    %c0_i32_0 = arith.constant 0 : i32
    return %arg0, %c0_i32 : i32, i32
  }
  func.func @transform_1(%arg0: i32) -> (i32, i32) {
    %c0_i32 = arith.constant 0 : i32
    %c0_i32_0 = arith.constant 0 : i32
    return %arg0, %c0_i32 : i32, i32
  }
  func.func @transform_2(%arg0: i32) -> (i32, i32) {
    %c0_i32 = arith.constant 0 : i32
    %c0_i32_0 = arith.constant 0 : i32
    return %arg0, %c0_i32 : i32, i32
  }
}

</mosaic_0001>

<bundles_post_ra>
// kernel: tpu_custom_call.1
= control target key start
LH: loop header
LB: loop body
LE: loop exit
PB: predicated region body
PF: predicated region fallthrough
CT: control target
= control target key end

     0   :  { %7 = vsyncpa [#allocation3], 0  ;;  %s197_s0 = inlined_call_operand.hbm [shape: f32[4,1024], index: 0, kind: input, shape index: {}]   ;;  %s198_s1 = inlined_call_operand.hbm [shape: f32[4,1024], index: 1, kind: input, shape index: {}]   ;;  %s199_s2 = inlined_call_operand.hbm [shape: f32[4,1024], index: 2, kind: output, shape index: {}]  }
   0x1   :  { %8 = vsyncpa [#allocation6], 0 }
   0x2   :  { %9 = vsyncpa [#allocation4], 0  ;;  %s143_s9 = smov [#allocation2]   ;;  %s144_s11 = smov [#allocation5]  }
   0x3   :  { %s16_s10 = sshll.u32 %s143_s9, 4  ;;  %s26_s12 = sshll.u32 %s144_s11, 4  ;;  %s17_s10 = int_to_ptr.vmem [resolvable:$true] %s16_s10  ;;  %s27_s12 = int_to_ptr.vmem [resolvable:$true] %s26_s12 }
   0x4   :  { %s71_s15 = scalar_lea.hbm %s197_s0, 512 }
   0x5   :  { %p72_p0 = scmp.ne.s32.totalorder %s197_s0, %s71_s15  ;;  %p75_p1 = scmp.lt.u32.totalorder %s71_s15, %s197_s0 }
   0x7   :  { %p77_p2 = pnand %p75_p1, %p72_p0 }
   0x9   :  { %80 = shalt.err (!%p77_p2)
}
   0xa   :  { %s81_s20 = scalar_lea.vmem %s17_s10, 512  ;;  %p86_p4 = scmp.lt.s32.totalorder %s17_s10, %s17_s10 }
   0xb   :  { %p82_p3 = scmp.ne.s32.totalorder %s17_s10, %s81_s20  ;;  %p87_p5 = scmp.lt.s32.totalorder %s81_s20, %s81_s20 }
   0xd   :  { %p88_p6 = por %p87_p5, %p86_p4 }
   0xf   :  { %p89_p7 = pnand %p88_p6, %p82_p3 }
  0x11   :  { %92 = shalt.err (!%p89_p7)
}
  0x12   :  { %19 = dma.hbm_to_vmem [thread:$0]  %s197_s0, 512, %s17_s10, [#allocation3]  }
  0x13   :  { %s93_s25 = scalar_lea.hbm %s198_s1, 512 }
  0x14   :  { %p94_p8 = scmp.ne.s32.totalorder %s198_s1, %s93_s25  ;;  %p97_p9 = scmp.lt.u32.totalorder %s93_s25, %s198_s1 }
  0x16   :  { %p99_p10 = pnand %p97_p9, %p94_p8 }
  0x18   :  { %102 = shalt.err (!%p99_p10)
}
  0x19   :  { %s103_s30 = scalar_lea.vmem %s27_s12, 512  ;;  %p108_p12 = scmp.lt.s32.totalorder %s27_s12, %s27_s12 }
  0x1a   :  { %p104_p11 = scmp.ne.s32.totalorder %s27_s12, %s103_s30  ;;  %p109_p13 = scmp.lt.s32.totalorder %s103_s30, %s103_s30 }
  0x1c   :  { %p110_p0 = por %p109_p13, %p108_p12 }
  0x1e   :  { %p111_p1 = pnand %p110_p0, %p104_p11 }
  0x20   :  { %114 = shalt.err (!%p111_p1)
}
  0x21   :  { %29 = dma.hbm_to_vmem [thread:$0]  %s198_s1, 512, %s27_s12, [#allocation6]  }
  0x22   :  { %137 = dma.done.wait [#allocation3], 512  }
  0x23   :  { %138 = vsyncadd [#allocation3], 4294966784 }
  0x24   :  { %139 = dma.done.wait [#allocation6], 512  }
  0x25   :  { %140 = vsyncadd [#allocation6], 4294966784  ;;  %v36_v0 = vld [vmem:[#allocation2] sm:$0xff]  ;;  %v37_v2 = vld [vmem:[#allocation2 + $0x8] sm:$0xff]  ;;  %s145_s4 = smov [#allocation7]  }
  0x26   :  { %v40_v1 = vld [vmem:[#allocation5] sm:$0xff]  ;;  %s58_s5 = sshll.u32 %s145_s4, 4  ;;  %v41_v4 = vld [vmem:[#allocation5 + $0x8] sm:$0xff]  ;;  %v38_v5 = vld [vmem:[#allocation2 + $0x10] sm:$0xff]  ;;  %s59_s5 = int_to_ptr.vmem [resolvable:$true] %s58_s5 }
  0x27   :  { %v44_v3 = vsub.f32 %v36_v0, %v40_v1  ;;  %v42_v6 = vld [vmem:[#allocation5 + $0x10] sm:$0xff]  ;;  %v45_v7 = vsub.f32 %v37_v2, %v41_v4  ;;  %v39_v9 = vld [vmem:[#allocation2 + $0x18] sm:$0xff]  ;;  %s115_s1 = scalar_lea.vmem %s59_s5, 512  ;;  %p120_p3 = scmp.lt.s32.totalorder %s59_s5, %s59_s5 }
  0x28   :  { %v46_v8 = vsub.f32 %v38_v5, %v42_v6  ;;  %v43_v10 = vld [vmem:[#allocation5 + $0x18] sm:$0xff]  ;;  %p116_p2 = scmp.ne.s32.totalorder %s59_s5, %s115_s1  ;;  %p121_p4 = scmp.lt.s32.totalorder %s115_s1, %s115_s1 }
  0x29   :  { %48 = vst [vmem:[#allocation7] sm:$0xff] %v44_v3  ;;  %v47_v11 = vsub.f32 %v39_v9, %v43_v10  ;;  %49 = vst [vmem:[#allocation7 + $0x8] sm:$0xff] %v45_v7 }
  0x2a   :  { %50 = vst [vmem:[#allocation7 + $0x10] sm:$0xff] %v46_v8  ;;  %p122_p5 = por %p121_p4, %p120_p3 }
  0x2b   :  { %51 = vst [vmem:[#allocation7 + $0x18] sm:$0xff] %v47_v11 }
  0x2c   :  { %p123_p6 = pnand %p122_p5, %p116_p2 }
  0x2e   :  { %126 = shalt.err (!%p123_p6)
}
  0x2f   :  { %s127_s8 = scalar_lea.hbm %s199_s2, 512 }
  0x30   :  { %p128_p7 = scmp.ne.s32.totalorder %s199_s2, %s127_s8  ;;  %p131_p8 = scmp.lt.u32.totalorder %s127_s8, %s199_s2 }
  0x32   :  { %p133_p9 = pnand %p131_p8, %p128_p7 }
  0x34   :  { %136 = shalt.err (!%p133_p9)
}
  0x35   :  { %61 = dma.vmem_to_hbm [thread:$0]  %s59_s5, 512, %s199_s2, [#allocation4]  }
  0x36   :  { %141 = dma.done.wait [#allocation4], 512  }
  0x37   :  { %142 = vsyncadd [#allocation4], 4294966784 }
  0x38   :  { %65 = vsyncpa [#allocation3], 1 }
  0x39   :  { %66 = vsyncpa [#allocation6], 1 }
  0x3a   :  { %67 = vsyncpa [#allocation4], 1 }

</bundles_post_ra>
